<compile_context>
chip_gen: v5e
topology: v5e:2x2
jax: 0.10.0
libtpu: 0.0.40
codegen_flags: <defaults>
</compile_context>

<pallas_src>
import functools
import math

import jax
import jax.numpy as jnp
from jax.experimental import pallas as pl
from jax.experimental.pallas import tpu as pltpu


# ----------------------------- Pallas kernel -----------------------------

def conv_bn_relu_kernel(x_ref, w_ref, gamma_ref, beta_ref, o_ref, *,
                        kh, kw, stride, ho, wo, n, eps, depthwise):
    """Fused Conv2d (bias=False) + BatchNorm2d (training-mode batch stats) + ReLU.

    x_ref    : (stride*KW, N, Cin, hs*Wo)  column-shifted, row-flattened phase planes.
               Plane q = (i % stride)*KW + j holds, for tap (i, j), the input window whose
               rows are already stride-decomposed and whose columns are already shifted by j,
               flattened so that tap (i, j) is the contiguous slice [di*Wo : di*Wo + Ho*Wo]
               with di = i // stride.
    w_ref    : dense    : (KH*KW, Cout, Cin)   per-tap weight matrices
               depthwise: (C, KH*KW)           per-channel tap weights
    gamma_ref: (Cout, 1)   BN weight
    beta_ref : (Cout, 1)   BN bias
    o_ref    : (N, Cout, Ho*Wo)  post-ReLU output, spatial flattened on the lane axis.
    """
    hw = ho * wo
    count = float(n * hw)

    # ---- Convolution: per-tap accumulation, channel-major (Cout, Ho*Wo) lane-dense. ----
    accs = []
    for b in range(n):                      # static unroll (N is tiny)
        acc = None
        for i in range(kh):
            di, r = i // stride, i % stride
            for j in range(kw):
                q = r * kw + j
                # Contiguous last-dim ref slice -> no in-kernel reshape/relayout.
                patch = x_ref[q, b, :, di * wo: di * wo + hw]      # (Cin, Ho*Wo)
                if depthwise:
                    t = i * kw + j
                    contrib = patch * w_ref[:, t:t + 1]            # VPU, (C,HW)*(C,1)
                else:
                    contrib = jnp.dot(w_ref[i * kw + j], patch,    # MXU, (Cout,Cin)@(Cin,HW)
                                      preferred_element_type=jnp.float32)
                acc = contrib if acc is None else acc + contrib
        accs.append(acc)                                           # (Cout, Ho*Wo) f32

    # ---- BatchNorm training-mode statistics over (N, H, W): two-pass for stability. ----
    ssum = jnp.sum(accs[0], axis=-1, keepdims=True)
    for b in range(1, n):
        ssum = ssum + jnp.sum(accs[b], axis=-1, keepdims=True)
    mean = ssum / count                                            # (Cout, 1)

    centered = [a - mean for a in accs]
    vsum = jnp.sum(centered[0] * centered[0], axis=-1, keepdims=True)
    for b in range(1, n):
        vsum = vsum + jnp.sum(centered[b] * centered[b], axis=-1, keepdims=True)
    var = vsum / count                                             # (Cout, 1) biased var

    scale = gamma_ref[...] * jax.lax.rsqrt(var + eps)              # rsqrt -> EUP slot
    shift = beta_ref[...]

    # ---- Affine + ReLU, lane-dense stores. ----
    for b in range(n):
        o_ref[b] = jnp.maximum(centered[b] * scale + shift, 0.0).astype(o_ref.dtype)


# ----------------------------- Wrapper -----------------------------

def _prepare_planes(x_nchw, kh, kw, stride, padding):
    """NCHW -> (stride*KW, N, Cin, hs*Wo) column-shifted, row-flattened phase planes.

    Plane (r, j) (r = row phase, j = kernel column) holds
        plane[r*KW+j][n, ci, h*Wo + w] = x_pad[n, ci, stride*h + r, stride*(w + j//stride) + j%stride]
    so that in the kernel, tap (i, j) is the contiguous slice [ (i//stride)*Wo : ... + Ho*Wo ].
    This is the only XLA layout-glue pass; the kernel itself performs no reshapes/concats.
    """
    N, Cin, H, W = x_nchw.shape
    s = stride
    Hp, Wp = H + 2 * padding, W + 2 * padding
    Ho = (Hp - kh) // s + 1
    Wo = (Wp - kw) // s + 1
    hs = Ho + (kh - 1) // s
    ws = Wo + (kw - 1) // s

    x = x_nchw.astype(jnp.float32)
    ph = max(0, s * hs - Hp)
    pw = max(0, s * ws - Wp)
    xp = jnp.pad(x, ((0, 0), (0, 0), (padding, padding + ph), (padding, padding + pw)))
    xp = xp[:, :, :s * hs, :s * ws]                                # (N, Cin, s*hs, s*ws)

    x6 = xp.reshape(N, Cin, hs, s, ws, s)                          # split out stride phases
    planes = []
    for r in range(s):
        for j in range(kw):
            c, dj = j % s, j // s
            q = x6[:, :, :, r, dj:dj + Wo, c]                      # (N, Cin, hs, Wo)
            planes.append(q.reshape(N, Cin, hs * Wo))
    planes = jnp.stack(planes, axis=0)                             # (s*KW, N, Cin, hs*Wo)
    return planes, Ho, Wo


def conv_block_forward(x_nchw, weight, gamma, beta, *, stride=1, padding=1,
                       groups=1, eps=1e-5):
    """ConvBlock.forward == relu(batchnorm_train(conv2d(x, bias=False))) on TPU via Pallas."""
    N, Cin, H, W = x_nchw.shape
    Cout, Cin_g, KH, KW = weight.shape
    assert Cin_g == Cin // groups
    if groups == 1:
        depthwise = False
    elif groups == Cin and Cin == Cout and Cin_g == 1:
        depthwise = True
    else:
        raise NotImplementedError("only groups==1 or depthwise groups==C are used by this model")

    planes, Ho, Wo = _prepare_planes(x_nchw, KH, KW, stride, padding)
    HW = Ho * Wo

    if depthwise:
        w2 = weight[:, 0].reshape(Cout, KH * KW).astype(jnp.float32)              # (C, KH*KW)
    else:
        w2 = jnp.transpose(weight, (2, 3, 0, 1)).reshape(KH * KW, Cout, Cin)      # (T, Cout, Cin)
        w2 = w2.astype(jnp.float32)
    g2 = gamma.astype(jnp.float32).reshape(Cout, 1)
    b2 = beta.astype(jnp.float32).reshape(Cout, 1)

    kernel = functools.partial(conv_bn_relu_kernel, kh=KH, kw=KW, stride=stride,
                               ho=Ho, wo=Wo, n=N, eps=float(eps), depthwise=depthwise)

    w_ndim = w2.ndim
    y = pl.pallas_call(
        kernel,
        out_shape=jax.ShapeDtypeStruct((N, Cout, HW), jnp.float32),
        grid=(1,),                              # whole batch in one step; stats fused in-kernel
        in_specs=[
            pl.BlockSpec(planes.shape, lambda i: (0, 0, 0, 0)),
            pl.BlockSpec(w2.shape, lambda i: (0,) * w_ndim),
            pl.BlockSpec((Cout, 1), lambda i: (0, 0)),
            pl.BlockSpec((Cout, 1), lambda i: (0, 0)),
        ],
        out_specs=pl.BlockSpec((N, Cout, HW), lambda i: (0, 0, 0)),
        compiler_params=pltpu.CompilerParams(dimension_semantics=("arbitrary",)),
    )(planes, w2, g2, b2)

    return y.reshape(N, Cout, Ho, Wo)           # NCHW, free reshape


# ----------------------------- Reference (pure JAX, for verification) -----------------------------

def conv_block_reference(x_nchw, weight, gamma, beta, *, stride=1, padding=1,
                         groups=1, eps=1e-5):
    conv = jax.lax.conv_general_dilated(
        x_nchw.astype(jnp.float32), weight.astype(jnp.float32),
        window_strides=(stride, stride),
        padding=((padding, padding), (padding, padding)),
        dimension_numbers=("NCHW", "OIHW", "NCHW"),
        feature_group_count=groups,
        precision=jax.lax.Precision.HIGHEST)
    mean = jnp.mean(conv, axis=(0, 2, 3), keepdims=True)
    var = jnp.mean(jnp.square(conv - mean), axis=(0, 2, 3), keepdims=True)
    xhat = (conv - mean) / jnp.sqrt(var + eps)
    out = xhat * gamma.reshape(1, -1, 1, 1) + beta.reshape(1, -1, 1, 1)
    return jnp.maximum(out, 0.0)


# ----------------------------- Main -----------------------------

if __name__ == "__main__":
    key = jax.random.PRNGKey(0)

    # Small ConvBlock configurations drawn from MobileNetPITSN:
    # (name, in_ch, out_ch, kernel, stride, pad, groups, H=W)
    configs = [
        ("inputblock_3x3_s2", 3, 8, 3, 2, 1, 1, 16),
        ("supernet_3x3_s1", 8, 16, 3, 1, 1, 1, 16),
        ("supernet_5x5_s1", 8, 16, 5, 1, 2, 1, 16),
        ("depthwise_3x3_s1", 8, 8, 3, 1, 1, 8, 16),
        ("depthwise_3x3_s2", 16, 16, 3, 2, 1, 16, 16),
        ("pointwise_1x1", 8, 16, 1, 1, 0, 1, 16),
    ]
    N = 2

    for name, cin, cout, k, s, p, g, hw in configs:
        key, kx, kw_, kg, kb = jax.random.split(key, 5)
        x = jax.random.normal(kx, (N, cin, hw, hw), dtype=jnp.float32)

        # kaiming_normal_ (fan_in): std = sqrt(2 / fan_in), fan_in = (Cin/g) * KH * KW
        fan_in = (cin // g) * k * k
        weight = math.sqrt(2.0 / fan_in) * jax.random.normal(
            kw_, (cout, cin // g, k, k), dtype=jnp.float32)
        gamma = 1.0 + 0.1 * jax.random.normal(kg, (cout,), dtype=jnp.float32)
        beta = 0.1 * jax.random.normal(kb, (cout,), dtype=jnp.float32)

        out = conv_block_forward(x, weight, gamma, beta, stride=s, padding=p, groups=g)
        out = jax.block_until_ready(out)

        ref = conv_block_reference(x, weight, gamma, beta, stride=s, padding=p, groups=g)
        assert out.shape == ref.shape, (name, out.shape, ref.shape)
        err = float(jnp.max(jnp.abs(out - ref)))
        assert err < 2e-4, (name, err)

    print("KERNEL_OK")
</pallas_src>

<mosaic_0001>
module attributes {stable_mosaic.version = 11 : i64} {
  func.func @conv_bn_relu_kernel(%arg0: i32, %arg1: memref<6x2x3x72xf32, #tpu.memory_space<vmem>>, %arg2: memref<9x8x3xf32, #tpu.memory_space<vmem>>, %arg3: memref<8x1xf32, #tpu.memory_space<vmem>>, %arg4: memref<8x1xf32, #tpu.memory_space<vmem>>, %arg5: memref<2x8x64xf32, #tpu.memory_space<vmem>>) attributes {dimension_semantics = [#tpu.dimension_semantics<arbitrary>], iteration_bounds = array<i64: 1>, scalar_prefetch = 0 : i64, scratch_operands = 0 : i64, tpu.core_type = #tpu.core_type<tc>, window_params = [{pipeline_mode = #tpu.pipeline_mode<synchronous>, transform_indices = @transform_0, window_bounds = array<i64: 6, 2, 3, 72>}, {pipeline_mode = #tpu.pipeline_mode<synchronous>, transform_indices = @transform_1, window_bounds = array<i64: 9, 8, 3>}, {pipeline_mode = #tpu.pipeline_mode<synchronous>, transform_indices = @transform_2, window_bounds = array<i64: 8, 1>}, {pipeline_mode = #tpu.pipeline_mode<synchronous>, transform_indices = @transform_3, window_bounds = array<i64: 8, 1>}, {pipeline_mode = #tpu.pipeline_mode<synchronous>, transform_indices = @transform_4, window_bounds = array<i64: 2, 8, 64>}]} {
    %c0 = arith.constant 0 : index
    %c0_0 = arith.constant 0 : index
    %c0_1 = arith.constant 0 : index
    %c0_2 = arith.constant 0 : index
    %0 = vector.load %arg1[%c0, %c0_0, %c0_1, %c0_2] : memref<6x2x3x72xf32, #tpu.memory_space<vmem>>, vector<1x1x3x64xf32>
    %1 = vector.shape_cast %0 : vector<1x1x3x64xf32> to vector<3x64xf32>
    %c0_3 = arith.constant 0 : index
    %c0_4 = arith.constant 0 : index
    %c0_5 = arith.constant 0 : index
    %2 = vector.load %arg2[%c0_3, %c0_4, %c0_5] : memref<9x8x3xf32, #tpu.memory_space<vmem>>, vector<1x8x3xf32>
    %3 = vector.shape_cast %2 : vector<1x8x3xf32> to vector<8x3xf32>
    %cst = arith.constant dense<0.000000e+00> : vector<8x64xf32>
    %4 = tpu.matmul %3, %1, %cst {dimension_numbers = #tpu.dot_dimension_numbers<[1], [0], [0], [1], [0, 0, 1, 1], [], []>} : vector<8x3xf32>, vector<3x64xf32>, vector<8x64xf32> -> vector<8x64xf32>
    %c1 = arith.constant 1 : index
    %c0_6 = arith.constant 0 : index
    %c0_7 = arith.constant 0 : index
    %c0_8 = arith.constant 0 : index
    %5 = vector.load %arg1[%c1, %c0_6, %c0_7, %c0_8] : memref<6x2x3x72xf32, #tpu.memory_space<vmem>>, vector<1x1x3x64xf32>
    %6 = vector.shape_cast %5 : vector<1x1x3x64xf32> to vector<3x64xf32>
    %c1_9 = arith.constant 1 : index
    %c0_10 = arith.constant 0 : index
    %c0_11 = arith.constant 0 : index
    %7 = vector.load %arg2[%c1_9, %c0_10, %c0_11] : memref<9x8x3xf32, #tpu.memory_space<vmem>>, vector<1x8x3xf32>
    %8 = vector.shape_cast %7 : vector<1x8x3xf32> to vector<8x3xf32>
    %cst_12 = arith.constant dense<0.000000e+00> : vector<8x64xf32>
    %9 = tpu.matmul %8, %6, %cst_12 {dimension_numbers = #tpu.dot_dimension_numbers<[1], [0], [0], [1], [0, 0, 1, 1], [], []>} : vector<8x3xf32>, vector<3x64xf32>, vector<8x64xf32> -> vector<8x64xf32>
    %10 = arith.addf %4, %9 : vector<8x64xf32>
    %c2 = arith.constant 2 : index
    %c0_13 = arith.constant 0 : index
    %c0_14 = arith.constant 0 : index
    %c0_15 = arith.constant 0 : index
    %11 = vector.load %arg1[%c2, %c0_13, %c0_14, %c0_15] : memref<6x2x3x72xf32, #tpu.memory_space<vmem>>, vector<1x1x3x64xf32>
    %12 = vector.shape_cast %11 : vector<1x1x3x64xf32> to vector<3x64xf32>
    %c2_16 = arith.constant 2 : index
    %c0_17 = arith.constant 0 : index
    %c0_18 = arith.constant 0 : index
    %13 = vector.load %arg2[%c2_16, %c0_17, %c0_18] : memref<9x8x3xf32, #tpu.memory_space<vmem>>, vector<1x8x3xf32>
    %14 = vector.shape_cast %13 : vector<1x8x3xf32> to vector<8x3xf32>
    %cst_19 = arith.constant dense<0.000000e+00> : vector<8x64xf32>
    %15 = tpu.matmul %14, %12, %cst_19 {dimension_numbers = #tpu.dot_dimension_numbers<[1], [0], [0], [1], [0, 0, 1, 1], [], []>} : vector<8x3xf32>, vector<3x64xf32>, vector<8x64xf32> -> vector<8x64xf32>
    %16 = arith.addf %10, %15 : vector<8x64xf32>
    %c3 = arith.constant 3 : index
    %c0_20 = arith.constant 0 : index
    %c0_21 = arith.constant 0 : index
    %c0_22 = arith.constant 0 : index
    %17 = vector.load %arg1[%c3, %c0_20, %c0_21, %c0_22] : memref<6x2x3x72xf32, #tpu.memory_space<vmem>>, vector<1x1x3x64xf32>
    %18 = vector.shape_cast %17 : vector<1x1x3x64xf32> to vector<3x64xf32>
    %c3_23 = arith.constant 3 : index
    %c0_24 = arith.constant 0 : index
    %c0_25 = arith.constant 0 : index
    %19 = vector.load %arg2[%c3_23, %c0_24, %c0_25] : memref<9x8x3xf32, #tpu.memory_space<vmem>>, vector<1x8x3xf32>
    %20 = vector.shape_cast %19 : vector<1x8x3xf32> to vector<8x3xf32>
    %cst_26 = arith.constant dense<0.000000e+00> : vector<8x64xf32>
    %21 = tpu.matmul %20, %18, %cst_26 {dimension_numbers = #tpu.dot_dimension_numbers<[1], [0], [0], [1], [0, 0, 1, 1], [], []>} : vector<8x3xf32>, vector<3x64xf32>, vector<8x64xf32> -> vector<8x64xf32>
    %22 = arith.addf %16, %21 : vector<8x64xf32>
    %c4 = arith.constant 4 : index
    %c0_27 = arith.constant 0 : index
    %c0_28 = arith.constant 0 : index
    %c0_29 = arith.constant 0 : index
    %23 = vector.load %arg1[%c4, %c0_27, %c0_28, %c0_29] : memref<6x2x3x72xf32, #tpu.memory_space<vmem>>, vector<1x1x3x64xf32>
    %24 = vector.shape_cast %23 : vector<1x1x3x64xf32> to vector<3x64xf32>
    %c4_30 = arith.constant 4 : index
    %c0_31 = arith.constant 0 : index
    %c0_32 = arith.constant 0 : index
    %25 = vector.load %arg2[%c4_30, %c0_31, %c0_32] : memref<9x8x3xf32, #tpu.memory_space<vmem>>, vector<1x8x3xf32>
    %26 = vector.shape_cast %25 : vector<1x8x3xf32> to vector<8x3xf32>
    %cst_33 = arith.constant dense<0.000000e+00> : vector<8x64xf32>
    %27 = tpu.matmul %26, %24, %cst_33 {dimension_numbers = #tpu.dot_dimension_numbers<[1], [0], [0], [1], [0, 0, 1, 1], [], []>} : vector<8x3xf32>, vector<3x64xf32>, vector<8x64xf32> -> vector<8x64xf32>
    %28 = arith.addf %22, %27 : vector<8x64xf32>
    %c5 = arith.constant 5 : index
    %c0_34 = arith.constant 0 : index
    %c0_35 = arith.constant 0 : index
    %c0_36 = arith.constant 0 : index
    %29 = vector.load %arg1[%c5, %c0_34, %c0_35, %c0_36] : memref<6x2x3x72xf32, #tpu.memory_space<vmem>>, vector<1x1x3x64xf32>
    %30 = vector.shape_cast %29 : vector<1x1x3x64xf32> to vector<3x64xf32>
    %c5_37 = arith.constant 5 : index
    %c0_38 = arith.constant 0 : index
    %c0_39 = arith.constant 0 : index
    %31 = vector.load %arg2[%c5_37, %c0_38, %c0_39] : memref<9x8x3xf32, #tpu.memory_space<vmem>>, vector<1x8x3xf32>
    %32 = vector.shape_cast %31 : vector<1x8x3xf32> to vector<8x3xf32>
    %cst_40 = arith.constant dense<0.000000e+00> : vector<8x64xf32>
    %33 = tpu.matmul %32, %30, %cst_40 {dimension_numbers = #tpu.dot_dimension_numbers<[1], [0], [0], [1], [0, 0, 1, 1], [], []>} : vector<8x3xf32>, vector<3x64xf32>, vector<8x64xf32> -> vector<8x64xf32>
    %34 = arith.addf %28, %33 : vector<8x64xf32>
    %c0_41 = arith.constant 0 : index
    %c0_42 = arith.constant 0 : index
    %c0_43 = arith.constant 0 : index
    %c8 = arith.constant 8 : index
    %35 = vector.load %arg1[%c0_41, %c0_42, %c0_43, %c8] : memref<6x2x3x72xf32, #tpu.memory_space<vmem>>, vector<1x1x3x64xf32>
    %36 = vector.shape_cast %35 : vector<1x1x3x64xf32> to vector<3x64xf32>
    %c6 = arith.constant 6 : index
    %c0_44 = arith.constant 0 : index
    %c0_45 = arith.constant 0 : index
    %37 = vector.load %arg2[%c6, %c0_44, %c0_45] : memref<9x8x3xf32, #tpu.memory_space<vmem>>, vector<1x8x3xf32>
    %38 = vector.shape_cast %37 : vector<1x8x3xf32> to vector<8x3xf32>
    %cst_46 = arith.constant dense<0.000000e+00> : vector<8x64xf32>
    %39 = tpu.matmul %38, %36, %cst_46 {dimension_numbers = #tpu.dot_dimension_numbers<[1], [0], [0], [1], [0, 0, 1, 1], [], []>} : vector<8x3xf32>, vector<3x64xf32>, vector<8x64xf32> -> vector<8x64xf32>
    %40 = arith.addf %34, %39 : vector<8x64xf32>
    %c1_47 = arith.constant 1 : index
    %c0_48 = arith.constant 0 : index
    %c0_49 = arith.constant 0 : index
    %c8_50 = arith.constant 8 : index
    %41 = vector.load %arg1[%c1_47, %c0_48, %c0_49, %c8_50] : memref<6x2x3x72xf32, #tpu.memory_space<vmem>>, vector<1x1x3x64xf32>
    %42 = vector.shape_cast %41 : vector<1x1x3x64xf32> to vector<3x64xf32>
    %c7 = arith.constant 7 : index
    %c0_51 = arith.constant 0 : index
    %c0_52 = arith.constant 0 : index
    %43 = vector.load %arg2[%c7, %c0_51, %c0_52] : memref<9x8x3xf32, #tpu.memory_space<vmem>>, vector<1x8x3xf32>
    %44 = vector.shape_cast %43 : vector<1x8x3xf32> to vector<8x3xf32>
    %cst_53 = arith.constant dense<0.000000e+00> : vector<8x64xf32>
    %45 = tpu.matmul %44, %42, %cst_53 {dimension_numbers = #tpu.dot_dimension_numbers<[1], [0], [0], [1], [0, 0, 1, 1], [], []>} : vector<8x3xf32>, vector<3x64xf32>, vector<8x64xf32> -> vector<8x64xf32>
    %46 = arith.addf %40, %45 : vector<8x64xf32>
    %c2_54 = arith.constant 2 : index
    %c0_55 = arith.constant 0 : index
    %c0_56 = arith.constant 0 : index
    %c8_57 = arith.constant 8 : index
    %47 = vector.load %arg1[%c2_54, %c0_55, %c0_56, %c8_57] : memref<6x2x3x72xf32, #tpu.memory_space<vmem>>, vector<1x1x3x64xf32>
    %48 = vector.shape_cast %47 : vector<1x1x3x64xf32> to vector<3x64xf32>
    %c8_58 = arith.constant 8 : index
    %c0_59 = arith.constant 0 : index
    %c0_60 = arith.constant 0 : index
    %49 = vector.load %arg2[%c8_58, %c0_59, %c0_60] : memref<9x8x3xf32, #tpu.memory_space<vmem>>, vector<1x8x3xf32>
    %50 = vector.shape_cast %49 : vector<1x8x3xf32> to vector<8x3xf32>
    %cst_61 = arith.constant dense<0.000000e+00> : vector<8x64xf32>
    %51 = tpu.matmul %50, %48, %cst_61 {dimension_numbers = #tpu.dot_dimension_numbers<[1], [0], [0], [1], [0, 0, 1, 1], [], []>} : vector<8x3xf32>, vector<3x64xf32>, vector<8x64xf32> -> vector<8x64xf32>
    %52 = arith.addf %46, %51 : vector<8x64xf32>
    %c0_62 = arith.constant 0 : index
    %c1_63 = arith.constant 1 : index
    %c0_64 = arith.constant 0 : index
    %c0_65 = arith.constant 0 : index
    %53 = vector.load %arg1[%c0_62, %c1_63, %c0_64, %c0_65] : memref<6x2x3x72xf32, #tpu.memory_space<vmem>>, vector<1x1x3x64xf32>
    %54 = vector.shape_cast %53 : vector<1x1x3x64xf32> to vector<3x64xf32>
    %c0_66 = arith.constant 0 : index
    %c0_67 = arith.constant 0 : index
    %c0_68 = arith.constant 0 : index
    %55 = vector.load %arg2[%c0_66, %c0_67, %c0_68] : memref<9x8x3xf32, #tpu.memory_space<vmem>>, vector<1x8x3xf32>
    %56 = vector.shape_cast %55 : vector<1x8x3xf32> to vector<8x3xf32>
    %cst_69 = arith.constant dense<0.000000e+00> : vector<8x64xf32>
    %57 = tpu.matmul %56, %54, %cst_69 {dimension_numbers = #tpu.dot_dimension_numbers<[1], [0], [0], [1], [0, 0, 1, 1], [], []>} : vector<8x3xf32>, vector<3x64xf32>, vector<8x64xf32> -> vector<8x64xf32>
    %c1_70 = arith.constant 1 : index
    %c1_71 = arith.constant 1 : index
    %c0_72 = arith.constant 0 : index
    %c0_73 = arith.constant 0 : index
    %58 = vector.load %arg1[%c1_70, %c1_71, %c0_72, %c0_73] : memref<6x2x3x72xf32, #tpu.memory_space<vmem>>, vector<1x1x3x64xf32>
    %59 = vector.shape_cast %58 : vector<1x1x3x64xf32> to vector<3x64xf32>
    %c1_74 = arith.constant 1 : index
    %c0_75 = arith.constant 0 : index
    %c0_76 = arith.constant 0 : index
    %60 = vector.load %arg2[%c1_74, %c0_75, %c0_76] : memref<9x8x3xf32, #tpu.memory_space<vmem>>, vector<1x8x3xf32>
    %61 = vector.shape_cast %60 : vector<1x8x3xf32> to vector<8x3xf32>
    %cst_77 = arith.constant dense<0.000000e+00> : vector<8x64xf32>
    %62 = tpu.matmul %61, %59, %cst_77 {dimension_numbers = #tpu.dot_dimension_numbers<[1], [0], [0], [1], [0, 0, 1, 1], [], []>} : vector<8x3xf32>, vector<3x64xf32>, vector<8x64xf32> -> vector<8x64xf32>
    %63 = arith.addf %57, %62 : vector<8x64xf32>
    %c2_78 = arith.constant 2 : index
    %c1_79 = arith.constant 1 : index
    %c0_80 = arith.constant 0 : index
    %c0_81 = arith.constant 0 : index
    %64 = vector.load %arg1[%c2_78, %c1_79, %c0_80, %c0_81] : memref<6x2x3x72xf32, #tpu.memory_space<vmem>>, vector<1x1x3x64xf32>
    %65 = vector.shape_cast %64 : vector<1x1x3x64xf32> to vector<3x64xf32>
    %c2_82 = arith.constant 2 : index
    %c0_83 = arith.constant 0 : index
    %c0_84 = arith.constant 0 : index
    %66 = vector.load %arg2[%c2_82, %c0_83, %c0_84] : memref<9x8x3xf32, #tpu.memory_space<vmem>>, vector<1x8x3xf32>
    %67 = vector.shape_cast %66 : vector<1x8x3xf32> to vector<8x3xf32>
    %cst_85 = arith.constant dense<0.000000e+00> : vector<8x64xf32>
    %68 = tpu.matmul %67, %65, %cst_85 {dimension_numbers = #tpu.dot_dimension_numbers<[1], [0], [0], [1], [0, 0, 1, 1], [], []>} : vector<8x3xf32>, vector<3x64xf32>, vector<8x64xf32> -> vector<8x64xf32>
    %69 = arith.addf %63, %68 : vector<8x64xf32>
    %c3_86 = arith.constant 3 : index
    %c1_87 = arith.constant 1 : index
    %c0_88 = arith.constant 0 : index
    %c0_89 = arith.constant 0 : index
    %70 = vector.load %arg1[%c3_86, %c1_87, %c0_88, %c0_89] : memref<6x2x3x72xf32, #tpu.memory_space<vmem>>, vector<1x1x3x64xf32>
    %71 = vector.shape_cast %70 : vector<1x1x3x64xf32> to vector<3x64xf32>
    %c3_90 = arith.constant 3 : index
    %c0_91 = arith.constant 0 : index
    %c0_92 = arith.constant 0 : index
    %72 = vector.load %arg2[%c3_90, %c0_91, %c0_92] : memref<9x8x3xf32, #tpu.memory_space<vmem>>, vector<1x8x3xf32>
    %73 = vector.shape_cast %72 : vector<1x8x3xf32> to vector<8x3xf32>
    %cst_93 = arith.constant dense<0.000000e+00> : vector<8x64xf32>
    %74 = tpu.matmul %73, %71, %cst_93 {dimension_numbers = #tpu.dot_dimension_numbers<[1], [0], [0], [1], [0, 0, 1, 1], [], []>} : vector<8x3xf32>, vector<3x64xf32>, vector<8x64xf32> -> vector<8x64xf32>
    %75 = arith.addf %69, %74 : vector<8x64xf32>
    %c4_94 = arith.constant 4 : index
    %c1_95 = arith.constant 1 : index
    %c0_96 = arith.constant 0 : index
    %c0_97 = arith.constant 0 : index
    %76 = vector.load %arg1[%c4_94, %c1_95, %c0_96, %c0_97] : memref<6x2x3x72xf32, #tpu.memory_space<vmem>>, vector<1x1x3x64xf32>
    %77 = vector.shape_cast %76 : vector<1x1x3x64xf32> to vector<3x64xf32>
    %c4_98 = arith.constant 4 : index
    %c0_99 = arith.constant 0 : index
    %c0_100 = arith.constant 0 : index
    %78 = vector.load %arg2[%c4_98, %c0_99, %c0_100] : memref<9x8x3xf32, #tpu.memory_space<vmem>>, vector<1x8x3xf32>
    %79 = vector.shape_cast %78 : vector<1x8x3xf32> to vector<8x3xf32>
    %cst_101 = arith.constant dense<0.000000e+00> : vector<8x64xf32>
    %80 = tpu.matmul %79, %77, %cst_101 {dimension_numbers = #tpu.dot_dimension_numbers<[1], [0], [0], [1], [0, 0, 1, 1], [], []>} : vector<8x3xf32>, vector<3x64xf32>, vector<8x64xf32> -> vector<8x64xf32>
    %81 = arith.addf %75, %80 : vector<8x64xf32>
    %c5_102 = arith.constant 5 : index
    %c1_103 = arith.constant 1 : index
    %c0_104 = arith.constant 0 : index
    %c0_105 = arith.constant 0 : index
    %82 = vector.load %arg1[%c5_102, %c1_103, %c0_104, %c0_105] : memref<6x2x3x72xf32, #tpu.memory_space<vmem>>, vector<1x1x3x64xf32>
    %83 = vector.shape_cast %82 : vector<1x1x3x64xf32> to vector<3x64xf32>
    %c5_106 = arith.constant 5 : index
    %c0_107 = arith.constant 0 : index
    %c0_108 = arith.constant 0 : index
    %84 = vector.load %arg2[%c5_106, %c0_107, %c0_108] : memref<9x8x3xf32, #tpu.memory_space<vmem>>, vector<1x8x3xf32>
    %85 = vector.shape_cast %84 : vector<1x8x3xf32> to vector<8x3xf32>
    %cst_109 = arith.constant dense<0.000000e+00> : vector<8x64xf32>
    %86 = tpu.matmul %85, %83, %cst_109 {dimension_numbers = #tpu.dot_dimension_numbers<[1], [0], [0], [1], [0, 0, 1, 1], [], []>} : vector<8x3xf32>, vector<3x64xf32>, vector<8x64xf32> -> vector<8x64xf32>
    %87 = arith.addf %81, %86 : vector<8x64xf32>
    %c0_110 = arith.constant 0 : index
    %c1_111 = arith.constant 1 : index
    %c0_112 = arith.constant 0 : index
    %c8_113 = arith.constant 8 : index
    %88 = vector.load %arg1[%c0_110, %c1_111, %c0_112, %c8_113] : memref<6x2x3x72xf32, #tpu.memory_space<vmem>>, vector<1x1x3x64xf32>
    %89 = vector.shape_cast %88 : vector<1x1x3x64xf32> to vector<3x64xf32>
    %c6_114 = arith.constant 6 : index
    %c0_115 = arith.constant 0 : index
    %c0_116 = arith.constant 0 : index
    %90 = vector.load %arg2[%c6_114, %c0_115, %c0_116] : memref<9x8x3xf32, #tpu.memory_space<vmem>>, vector<1x8x3xf32>
    %91 = vector.shape_cast %90 : vector<1x8x3xf32> to vector<8x3xf32>
    %cst_117 = arith.constant dense<0.000000e+00> : vector<8x64xf32>
    %92 = tpu.matmul %91, %89, %cst_117 {dimension_numbers = #tpu.dot_dimension_numbers<[1], [0], [0], [1], [0, 0, 1, 1], [], []>} : vector<8x3xf32>, vector<3x64xf32>, vector<8x64xf32> -> vector<8x64xf32>
    %93 = arith.addf %87, %92 : vector<8x64xf32>
    %c1_118 = arith.constant 1 : index
    %c1_119 = arith.constant 1 : index
    %c0_120 = arith.constant 0 : index
    %c8_121 = arith.constant 8 : index
    %94 = vector.load %arg1[%c1_118, %c1_119, %c0_120, %c8_121] : memref<6x2x3x72xf32, #tpu.memory_space<vmem>>, vector<1x1x3x64xf32>
    %95 = vector.shape_cast %94 : vector<1x1x3x64xf32> to vector<3x64xf32>
    %c7_122 = arith.constant 7 : index
    %c0_123 = arith.constant 0 : index
    %c0_124 = arith.constant 0 : index
    %96 = vector.load %arg2[%c7_122, %c0_123, %c0_124] : memref<9x8x3xf32, #tpu.memory_space<vmem>>, vector<1x8x3xf32>
    %97 = vector.shape_cast %96 : vector<1x8x3xf32> to vector<8x3xf32>
    %cst_125 = arith.constant dense<0.000000e+00> : vector<8x64xf32>
    %98 = tpu.matmul %97, %95, %cst_125 {dimension_numbers = #tpu.dot_dimension_numbers<[1], [0], [0], [1], [0, 0, 1, 1], [], []>} : vector<8x3xf32>, vector<3x64xf32>, vector<8x64xf32> -> vector<8x64xf32>
    %99 = arith.addf %93, %98 : vector<8x64xf32>
    %c2_126 = arith.constant 2 : index
    %c1_127 = arith.constant 1 : index
    %c0_128 = arith.constant 0 : index
    %c8_129 = arith.constant 8 : index
    %100 = vector.load %arg1[%c2_126, %c1_127, %c0_128, %c8_129] : memref<6x2x3x72xf32, #tpu.memory_space<vmem>>, vector<1x1x3x64xf32>
    %101 = vector.shape_cast %100 : vector<1x1x3x64xf32> to vector<3x64xf32>
    %c8_130 = arith.constant 8 : index
    %c0_131 = arith.constant 0 : index
    %c0_132 = arith.constant 0 : index
    %102 = vector.load %arg2[%c8_130, %c0_131, %c0_132] : memref<9x8x3xf32, #tpu.memory_space<vmem>>, vector<1x8x3xf32>
    %103 = vector.shape_cast %102 : vector<1x8x3xf32> to vector<8x3xf32>
    %cst_133 = arith.constant dense<0.000000e+00> : vector<8x64xf32>
    %104 = tpu.matmul %103, %101, %cst_133 {dimension_numbers = #tpu.dot_dimension_numbers<[1], [0], [0], [1], [0, 0, 1, 1], [], []>} : vector<8x3xf32>, vector<3x64xf32>, vector<8x64xf32> -> vector<8x64xf32>
    %105 = arith.addf %99, %104 : vector<8x64xf32>
    %cst_134 = arith.constant dense<0.000000e+00> : vector<8xf32>
    %106 = vector.multi_reduction <add>, %52, %cst_134 [1] : vector<8x64xf32> to vector<8xf32>
    %107 = vector.shape_cast %106 : vector<8xf32> to vector<8x1xf32>
    %cst_135 = arith.constant dense<0.000000e+00> : vector<8xf32>
    %108 = vector.multi_reduction <add>, %105, %cst_135 [1] : vector<8x64xf32> to vector<8xf32>
    %109 = vector.shape_cast %108 : vector<8xf32> to vector<8x1xf32>
    %110 = arith.addf %107, %109 : vector<8x1xf32>
    %cst_136 = arith.constant 1.280000e+02 : f32
    %111 = vector.broadcast %cst_136 : f32 to vector<8x1xf32>
    %112 = arith.divf %110, %111 : vector<8x1xf32>
    %113 = vector.broadcast %112 : vector<8x1xf32> to vector<8x64xf32>
    %114 = arith.subf %52, %113 : vector<8x64xf32>
    %115 = vector.broadcast %112 : vector<8x1xf32> to vector<8x64xf32>
    %116 = arith.subf %105, %115 : vector<8x64xf32>
    %117 = arith.mulf %114, %114 : vector<8x64xf32>
    %cst_137 = arith.constant dense<0.000000e+00> : vector<8xf32>
    %118 = vector.multi_reduction <add>, %117, %cst_137 [1] : vector<8x64xf32> to vector<8xf32>
    %119 = vector.shape_cast %118 : vector<8xf32> to vector<8x1xf32>
    %120 = arith.mulf %116, %116 : vector<8x64xf32>
    %cst_138 = arith.constant dense<0.000000e+00> : vector<8xf32>
    %121 = vector.multi_reduction <add>, %120, %cst_138 [1] : vector<8x64xf32> to vector<8xf32>
    %122 = vector.shape_cast %121 : vector<8xf32> to vector<8x1xf32>
    %123 = arith.addf %119, %122 : vector<8x1xf32>
    %cst_139 = arith.constant 1.280000e+02 : f32
    %124 = vector.broadcast %cst_139 : f32 to vector<8x1xf32>
    %125 = arith.divf %123, %124 : vector<8x1xf32>
    %c0_140 = arith.constant 0 : index
    %c0_141 = arith.constant 0 : index
    %126 = vector.load %arg3[%c0_140, %c0_141] : memref<8x1xf32, #tpu.memory_space<vmem>>, vector<8x1xf32>
    %cst_142 = arith.constant 9.99999974E-6 : f32
    %127 = vector.broadcast %cst_142 : f32 to vector<8x1xf32>
    %128 = arith.addf %125, %127 : vector<8x1xf32>
    %129 = math.rsqrt %128 : vector<8x1xf32>
    %130 = arith.mulf %126, %129 : vector<8x1xf32>
    %c0_143 = arith.constant 0 : index
    %c0_144 = arith.constant 0 : index
    %131 = vector.load %arg4[%c0_143, %c0_144] : memref<8x1xf32, #tpu.memory_space<vmem>>, vector<8x1xf32>
    %132 = vector.broadcast %130 : vector<8x1xf32> to vector<8x64xf32>
    %133 = arith.mulf %114, %132 : vector<8x64xf32>
    %134 = vector.broadcast %131 : vector<8x1xf32> to vector<8x64xf32>
    %135 = arith.addf %133, %134 : vector<8x64xf32>
    %cst_145 = arith.constant 0.000000e+00 : f32
    %136 = vector.broadcast %cst_145 : f32 to vector<8x64xf32>
    %137 = arith.maximumf %135, %136 : vector<8x64xf32>
    %c0_146 = arith.constant 0 : index
    %c0_147 = arith.constant 0 : index
    %c0_148 = arith.constant 0 : index
    %138 = vector.load %arg5[%c0_146, %c0_147, %c0_148] : memref<2x8x64xf32, #tpu.memory_space<vmem>>, vector<1x8x64xf32>
    %139 = vector.shape_cast %138 : vector<1x8x64xf32> to vector<8x64xf32>
    %140 = vector.shape_cast %137 : vector<8x64xf32> to vector<1x8x64xf32>
    tpu.vector_store %arg5[%c0_146, %c0_147, %c0_148], %140 {strides = array<i32>} : memref<2x8x64xf32, #tpu.memory_space<vmem>>, vector<1x8x64xf32>,
    %141 = vector.broadcast %130 : vector<8x1xf32> to vector<8x64xf32>
    %142 = arith.mulf %116, %141 : vector<8x64xf32>
    %143 = vector.broadcast %131 : vector<8x1xf32> to vector<8x64xf32>
    %144 = arith.addf %142, %143 : vector<8x64xf32>
    %cst_149 = arith.constant 0.000000e+00 : f32
    %145 = vector.broadcast %cst_149 : f32 to vector<8x64xf32>
    %146 = arith.maximumf %144, %145 : vector<8x64xf32>
    %c1_150 = arith.constant 1 : index
    %c0_151 = arith.constant 0 : index
    %c0_152 = arith.constant 0 : index
    %147 = vector.load %arg5[%c1_150, %c0_151, %c0_152] : memref<2x8x64xf32, #tpu.memory_space<vmem>>, vector<1x8x64xf32>
    %148 = vector.shape_cast %147 : vector<1x8x64xf32> to vector<8x64xf32>
    %149 = vector.shape_cast %146 : vector<8x64xf32> to vector<1x8x64xf32>
    tpu.vector_store %arg5[%c1_150, %c0_151, %c0_152], %149 {strides = array<i32>} : memref<2x8x64xf32, #tpu.memory_space<vmem>>, vector<1x8x64xf32>,
    return
  }
  func.func @transform_0(%arg0: i32) -> (i32, i32, i32, i32) {
    %c0_i32 = arith.constant 0 : i32
    %c0_i32_0 = arith.constant 0 : i32
    %c0_i32_1 = arith.constant 0 : i32
    %c0_i32_2 = arith.constant 0 : i32
    %c0_i32_3 = arith.constant 0 : i32
    return %c0_i32, %c0_i32_0, %c0_i32_1, %c0_i32_2 : i32, i32, i32, i32
  }
  func.func @transform_1(%arg0: i32) -> (i32, i32, i32) {
    %c0_i32 = arith.constant 0 : i32
    %c0_i32_0 = arith.constant 0 : i32
    %c0_i32_1 = arith.constant 0 : i32
    %c0_i32_2 = arith.constant 0 : i32
    return %c0_i32, %c0_i32_0, %c0_i32_1 : i32, i32, i32
  }
  func.func @transform_2(%arg0: i32) -> (i32, i32) {
    %c0_i32 = arith.constant 0 : i32
    %c0_i32_0 = arith.constant 0 : i32
    %c0_i32_1 = arith.constant 0 : i32
    return %c0_i32, %c0_i32_0 : i32, i32
  }
  func.func @transform_3(%arg0: i32) -> (i32, i32) {
    %c0_i32 = arith.constant 0 : i32
    %c0_i32_0 = arith.constant 0 : i32
    %c0_i32_1 = arith.constant 0 : i32
    return %c0_i32, %c0_i32_0 : i32, i32
  }
  func.func @transform_4(%arg0: i32) -> (i32, i32, i32) {
    %c0_i32 = arith.constant 0 : i32
    %c0_i32_0 = arith.constant 0 : i32
    %c0_i32_1 = arith.constant 0 : i32
    %c0_i32_2 = arith.constant 0 : i32
    return %c0_i32, %c0_i32_0, %c0_i32_1 : i32, i32, i32
  }
}

</mosaic_0001>

<bundles_post_ra>
// kernel: tpu_custom_call.1
= control target key start
LH: loop header
LB: loop body
LE: loop exit
PB: predicated region body
PF: predicated region fallthrough
CT: control target
= control target key end

     0   :  { %vm28_vm0 = vcmask 1042432   ;;  %s693_s19 = smov 120   ;;  %vm24_vm1 = vcmask 23552   ;;  %s838_s0 = inlined_call_operand.vmem [shape: f32[6,2,3,72], index: 0, kind: input, shape index: {}]   ;;  %s839_s1 = inlined_call_operand.vmem [shape: f32[9,8,3], index: 1, kind: input, shape index: {}]   ;;  %s840_s2 = inlined_call_operand.vmem [shape: f32[8,1], index: 2, kind: input, shape index: {}]   ;;  %s841_s3 = inlined_call_operand.vmem [shape: f32[8,1], index: 3, kind: input, shape index: {}]   ;;  %s842_s4 = inlined_call_operand.hbm [shape: f32[2,8,64], index: 4, kind: output, shape index: {}]  }
   0x1   :  { %v18_v0 = vld [vmem:[%s838_s0] sm:$0x7]  ;;  %v600_v1 = vld [vmem:[%s838_s0 + $0x8] sm:$0x7]  ;;  %v606_v2 = vld [vmem:[%s838_s0 + $0x10] sm:$0x7] }
   0x2   :  { %204 = vrot.lane.b32.xlu0 %v18_v0, %s693_s19  ;;  %v632_v3 = vld [vmem:[%s838_s0 + $0xc] sm:$0x7]  ;;  %602 = vmatpush.msk.msra.mxu0 %vm28_vm0, %v600_v1  ;;  %v607_v4 = vld [vmem:[%s839_s1 + $0x10] sm:$0xff] }
   0x3   :  { %264 = vrot.lane.b32.xlu1 %v606_v2, %s693_s19  ;;  %471 = vrot.lane.b32.xlu2 %v632_v3, %s693_s19 }
   0x4   :  { %608 = vmatpush.msk.msra.mxu2 %vm28_vm0, %v606_v2  ;;  %604 = vmatpush.msk.msra.mxu1 %vm28_vm0, %v18_v0 }
   0x5   :  { %9 = vsyncpa [#allocation3], 0  ;;  %609 = vmatmul.msk.f32.vlgmr.msra.gmra.mxu2 %vm24_vm1, %v607_v4  ;;  %v631_v5 = vld [vmem:[%s838_s0 + $0x4] sm:$0x7]  ;;  %v637_v6 = vld [vmem:[%s838_s0 + $0x14] sm:$0x7] }
   0x6   :  { %v610_v7 = vld [vmem:[%s838_s0 + $0x18] sm:$0x7]  ;;  %v601_v8 = vld [vmem:[%s839_s1 + $0x8] sm:$0xff]  ;;  %v19_v10 = vld [vmem:[%s839_s1] sm:$0xff]  ;;  %vm521_vm2 = vcmask 523264   ;;  %v694_v63 = vmov 128.0  }
   0x7   :  { %612 = vmatpush.msk.msra.mxu3 %vm28_vm0, %v610_v7  ;;  %v611_v9 = vld [vmem:[%s839_s1 + $0x18] sm:$0xff]  ;;  %603 = vmatmul.msk.f32.vlgmr.msra.gmra.mxu0 %vm24_vm1, %v601_v8  ;;  %v614_v11 = vld [vmem:[%s838_s0 + $0x20] sm:$0x7]  ;;  %v618_v13 = vld [vmem:[%s838_s0 + $0x28] sm:$0x7]  ;;  %663 = vrcp.f32 %v694_v63  ;;  %s588_s11 = sshll.u32 %s842_s4, 4  ;;  %s589_s11 = int_to_ptr.hbm [resolvable:$true] %s588_s11 }
   0x8   :  { %613 = vmatmul.msk.f32.vlgmr.msra.gmra.mxu3 %vm24_vm1, %v611_v9  ;;  %605 = vmatmul.msk.f32.vlgmr.msra.gmra.mxu1 %vm24_vm1, %v19_v10  ;;  %v615_v12 = vld [vmem:[%s839_s1 + $0x20] sm:$0xff]  ;;  %v619_v14 = vld [vmem:[%s839_s1 + $0x28] sm:$0xff]  ;;  %v622_v18 = vld [vmem:[%s839_s1 + $0x30] sm:$0xff]  ;;  %s698_s12 = smov 8  }
   0x9   :  { %616 = vmatpush.msk.msrb.mxu0 %vm28_vm0, %v614_v11  ;;  %620 = vmatpush.msk.msrb.mxu1 %vm28_vm0, %v618_v13  ;;  %v643_v16 = vld [vmem:[%s838_s0 + $0x24] sm:$0x7]  ;;  %v646_v22 = vld [vmem:[%s838_s0 + $0x2c] sm:$0x7]  ;;  %v640_v23 = vld [vmem:[%s838_s0 + $0x1c] sm:$0x7] }
   0xa   :  { %234 = vrot.lane.b32.xlu0 %v600_v1, %s693_s19  ;;  %v628_v20 = vld [vmem:[%s839_s1 + $0x40] sm:$0xff]  ;;  %v625_v24 = vld [vmem:[%s839_s1 + $0x38] sm:$0xff] }
   0xb   :  { %446 = vrot.lane.b32.xlu1 %v631_v5, %s693_s19  ;;  %496 = vrot.lane.b32.xlu2 %v637_v6, %s693_s19 }
   0xc   :  { %633 = vmatpush.msk.msra.mxu1 %vm28_vm0, %v632_v3 }
   0xd   :  { %v664_v0 = vpop.eup %663 }
   0xe   :  { %v530_v1 = vmul.f32 128.0, %v664_v0  ;;  %vm534_vm3 = vweird.f32 %v664_v0 }
   0xf   :  { %617 = vmatmul.msk.f32.vlgmr.msrb.gmra.mxu0 %vm24_vm1, %v615_v12 }
  0x10   :  { %621 = vmatmul.msk.f32.vlgmr.msrb.gmra.mxu1 %vm24_vm1, %v619_v14  ;;  %v531_v2 = vsub.f32 1.0, %v530_v1 }
  0x11   :  { %644 = vmatpush.msk.msrb.mxu1 %vm28_vm0, %v643_v16  ;;  %v695_v16 = vmov 0  }
  0x12   :  { %v532_v3 = vmul.f32 %v664_v0, %v531_v2  ;;  %661 = vset.pattern.permute.xlu0 %v695_v16  ;;  %662 = vset.pattern.permute.xlu1 %v695_v16 }
  0x18   :  { %634 = vmatmul.msk.f32.vlgmr.msra.gmra.mxu1 %vm24_vm1, %v601_v8 }
  0x20   :  { %645 = vmatmul.msk.f32.vlgmr.msrb.gmra.mxu1 %vm24_vm1, %v615_v12 }
  0x5d   :  { %v472_v15 = vpop.permute.xlu2 %471 }
  0x65   :  { %v497_v17 = vpop.permute.xlu2 %496 }
  0x66   :  { %653 = vmatpush.msk.msra.mxu1 %vm28_vm0, %v497_v17 }
  0x67   :  { %654 = vmatmul.msk.f32.vlgmr.msra.gmra.mxu1 %vm24_vm1, %v628_v20 }
  0x74   :  { %v205_v19 = vpop.permute.xlu0 %204 }
  0x75   :  { %623 = vmatpush.msk.msrb.mxu2 %vm28_vm0, %v205_v19  ;;  %v265_v21 = vpop.permute.xlu1 %264 }
  0x76   :  { %624 = vmatmul.msk.f32.vlgmr.msrb.gmra.mxu2 %vm24_vm1, %v622_v18  ;;  %629 = vmatpush.msk.msra.mxu0 %vm28_vm0, %v265_v21 }
  0x77   :  { %635 = vmatpush.msk.msra.mxu2 %vm28_vm0, %v631_v5  ;;  %630 = vmatmul.msk.f32.vlgmr.msra.gmra.mxu0 %vm24_vm1, %v628_v20 }
  0x78   :  { %641 = vmatpush.msk.msrb.mxu0 %vm28_vm0, %v640_v23 }
  0x79   :  { %647 = vmatpush.msk.msrb.mxu2 %vm28_vm0, %v646_v22 }
  0x7a   :  { %651 = vmatpush.msk.msra.mxu0 %vm28_vm0, %v472_v15 }
  0x7c   :  { %v235_v25 = vpop.permute.xlu0 %234 }
  0x7d   :  { %626 = vmatpush.msk.msrb.mxu3 %vm28_vm0, %v235_v25  ;;  %v447_v26 = vpop.permute.xlu1 %446 }
  0x7e   :  { %627 = vmatmul.msk.f32.vlgmr.msrb.gmra.mxu3 %vm24_vm1, %v625_v24  ;;  %636 = vmatmul.msk.f32.vlgmr.msra.gmra.mxu2 %vm24_vm1, %v19_v10 }
  0x7f   :  { %638 = vmatpush.msk.msra.mxu3 %vm28_vm0, %v637_v6  ;;  %642 = vmatmul.msk.f32.vlgmr.msrb.gmra.mxu0 %vm24_vm1, %v611_v9 }
  0x81   :  { %649 = vmatpush.msk.msrb.mxu3 %vm28_vm0, %v447_v26 }
  0x84   :  { %v49_v28 = vpop.f32.mrf.mxu0 }
  0x85   :  { %v75_v27 = vpop.f32.mrf.mxu1 }
  0x86   :  { %639 = vmatmul.msk.f32.vlgmr.msra.gmra.mxu3 %vm24_vm1, %v607_v4  ;;  %648 = vmatmul.msk.f32.vlgmr.msrb.gmra.mxu2 %vm24_vm1, %v619_v14  ;;  %v76_v29 = vadd.f32 %v75_v27, %v49_v28  ;;  %v533_v4 = vadd.f32 %v664_v0, %v532_v3  ;;  %v549_v28 = vld [vmem:[%s840_s2] sm:$0xff]  ;;  %s697_s2 = smov 128  }
  0x87   :  { %652 = vmatmul.msk.f32.vlgmr.msra.gmra.mxu0 %vm24_vm1, %v625_v24 }
  0x88   :  { %v105_v30 = vpop.f32.mrf.mxu2  ;;  %v535_v6 = vsel %vm534_vm3, %v664_v0, %v533_v4 }
  0x89   :  { %v108_v31 = vadd.f32 %v105_v30, %v76_v29 }
  0x8b   :  { %v136_v32 = vpop.f32.mrf.mxu3 }
  0x8c   :  { %v139_v33 = vadd.f32 %v136_v32, %v108_v31  ;;  %v167_v34 = vpop.f32.mrf.mxu0 }
  0x8d   :  { %v198_v35 = vpop.f32.mrf.mxu1 }
  0x8e   :  { %650 = vmatmul.msk.f32.vlgmr.msrb.gmra.mxu3 %vm24_vm1, %v622_v18  ;;  %v170_v36 = vadd.f32 %v167_v34, %v139_v33  ;;  %v562_v18 = vld [vmem:[%s841_s3] sm:$0xff]  ;;  %s696_s3 = smov [#allocation2]  }
  0x8f   :  { %s586_s8 = sshll.u32 %s696_s3, 4  ;;  %s587_s8 = int_to_ptr.vmem [resolvable:$true] %s586_s8 }
  0x90   :  { %v201_v38 = vadd.f32 %v198_v35, %v170_v36 }
  0x95   :  { %v316_v40 = vpop.f32.mrf.mxu1 }
  0x9d   :  { %v416_v50 = vpop.f32.mrf.mxu1 }
  0xe4   :  { %v517_v59 = vpop.f32.mrf.mxu1 }
  0xf4   :  { %v288_v39 = vpop.f32.mrf.mxu0 }
  0xf9   :  { %v228_v37 = vpop.f32.mrf.mxu2 }
  0xfa   :  { %v231_v41 = vadd.f32 %v228_v37, %v201_v38 }
  0xfc   :  { %v390_v47 = vpop.f32.mrf.mxu0 }
 0x101   :  { %v258_v42 = vpop.f32.mrf.mxu3  ;;  %v339_v45 = vpop.f32.mrf.mxu2 }
 0x102   :  { %v261_v43 = vadd.f32 %v258_v42, %v231_v41  ;;  %v340_v48 = vadd.f32 %v339_v45, %v316_v40 }
 0x104   :  { %v291_v44 = vadd.f32 %v288_v39, %v261_v43  ;;  %v492_v57 = vpop.f32.mrf.mxu0 }
 0x106   :  { %v522_v46 = vsel %vm521_vm2, %v291_v44, 0.0 }
 0x107   :  { %523 = vadd.xlane.f32.xlu0 %v522_v46 }
 0x109   :  { %v364_v49 = vpop.f32.mrf.mxu3  ;;  %v442_v53 = vpop.f32.mrf.mxu2 }
 0x10a   :  { %v367_v51 = vadd.f32 %v364_v49, %v340_v48 }
 0x10c   :  { %v393_v52 = vadd.f32 %v390_v47, %v367_v51 }
 0x10e   :  { %v419_v54 = vadd.f32 %v416_v50, %v393_v52 }
 0x110   :  { %v445_v55 = vadd.f32 %v442_v53, %v419_v54 }
 0x111   :  { %v467_v56 = vpop.f32.mrf.mxu3 }
 0x112   :  { %v470_v58 = vadd.f32 %v467_v56, %v445_v55 }
 0x114   :  { %v495_v60 = vadd.f32 %v492_v57, %v470_v58 }
 0x116   :  { %v520_v61 = vadd.f32 %v517_v59, %v495_v60 }
 0x118   :  { %v525_v62 = vsel %vm521_vm2, %v520_v61, 0.0 }
 0x119   :  { %526 = vadd.xlane.f32.xlu1 %v525_v62 }
 0x132   :  { %571 = vperm.xlu1 %662, %v562_v18  }
 0x17a   :  { %v524_v5 = vpop.xlane.xlu0 %523 }
 0x18c   :  { %v527_v7 = vpop.xlane.xlu1 %526 }
 0x18d   :  { %v528_v8 = vadd.f32 %v527_v7, %v524_v5 }
 0x18f   :  { %v536_v9 = vmul.f32 %v535_v6, %v528_v8 }
 0x191   :  { %v537_v10 = vsub.f32 %v291_v44, %v536_v9  ;;  %v538_v13 = vsub.f32 %v520_v61, %v536_v9 }
 0x193   :  { %v539_v11 = vmul.f32 %v537_v10, %v537_v10  ;;  %v543_v14 = vmul.f32 %v538_v13, %v538_v13 }
 0x195   :  { %v540_v12 = vsel %vm521_vm2, %v539_v11, 0.0  ;;  %v544_v15 = vsel %vm521_vm2, %v543_v14, 0.0 }
 0x196   :  { %541 = vadd.xlane.f32.xlu2 %v540_v12 }
 0x19e   :  { %545 = vadd.xlane.f32.xlu2 %v544_v15 }
 0x1a4   :  { %v572_v33 = vpop.permute.xlu1 %571 }
 0x209   :  { %v542_v17 = vpop.xlane.xlu2 %541 }
 0x211   :  { %v546_v19 = vpop.xlane.xlu2 %545 }
 0x212   :  { %v547_v20 = vadd.f32 %v546_v19, %v542_v17 }
 0x214   :  { %v548_v21 = vmul.f32 %v547_v20, %v535_v6 }
 0x216   :  { %v550_v22 = vadd.f32 1e-05, %v548_v21 }
 0x218   :  { %665 = vrsqrt.f32 %v550_v22  ;;  %vm557_vm5 = vweird.f32 %v550_v22 }
 0x21e   :  { %v666_v23 = vpop.eup %665 }
 0x21f   :  { %v552_v24 = vmul.f32 %v666_v23, %v550_v22  ;;  %vm558_vm4 = vweird.f32 %v666_v23 }
 0x220   :  { %vm559_vm6 = vmor %vm557_vm5, %vm558_vm4 }
 0x221   :  { %v553_v25 = vmul.f32 %v666_v23, %v552_v24 }
 0x223   :  { %v554_v26 = vmul.f32 0.5, %v553_v25 }
 0x225   :  { %v555_v27 = vsub.f32 1.5, %v554_v26 }
 0x227   :  { %v556_v29 = vmul.f32 %v666_v23, %v555_v27 }
 0x229   :  { %v560_v30 = vsel %vm559_vm6, %v666_v23, %v556_v29 }
 0x22a   :  { %v561_v31 = vmul.f32 %v560_v30, %v549_v28 }
 0x22c   :  { %565 = vperm.xlu0 %661, %v561_v31  }
 0x29e   :  { %v566_v32 = vpop.permute.xlu0 %565 }
 0x29f   :  { %v568_v34 = vmul.f32 %v566_v32, %v537_v10  ;;  %v577_v35 = vmul.f32 %v566_v32, %v538_v13 }
 0x2a1   :  { %v574_v36 = vadd.f32 %v572_v33, %v568_v34  ;;  %v578_v37 = vadd.f32 %v577_v35, %v572_v33 }
 0x2a3   :  { %v575_v38 = vmax.f32 %v574_v36, 0.0  ;;  %v579_v39 = vmax.f32 %v578_v37, 0.0 }
 0x2a5   :  { %576 = vst.msk [vmem:[#allocation2] sm:$0xff] %vm521_vm2, %v575_v38 }
 0x2a6   :  { %581 = vst.msk [vmem:[#allocation2 + $0x8] sm:$0xff] %vm521_vm2, %v579_v39 }
 0x2a7   :  { %594 = dma.vmem_to_hbm [thread:$0]  %s587_s8, 256, %s589_s11, [#allocation3], %s697_s2, %s697_s2, %s698_s12  }
 0x2a8   :  { %691 = dma.done.wait [#allocation3], 256  }
 0x2a9   :  { %692 = vsyncadd [#allocation3], 4294967040 }
 0x2aa   :  { %599 = vsyncpa [#allocation3], 1 }

</bundles_post_ra>
